<compile_context>
chip_gen: v7x
topology: tpu7x:2x2x1
jax: 0.10.0
libtpu: 0.0.40
codegen_flags: <defaults>
</compile_context>

<pallas_src>
import functools

import jax
import jax.numpy as jnp
from jax.experimental import pallas as pl
from jax.experimental.pallas import tpu as pltpu


def _interp_kernel(n_preds, n_pad, V, a1, a2,
                   tok_smem, tok_col_ref, uni_ref, bi_ref, tri_hbm,
                   out_ref, tri_buf, sems):
    # tok_smem : SMEM (B, L) int32          -- scalar-prefetched token ids
    # tok_col  : VMEM (1, n_pad, 1) int32   -- tokens 0..n_preds-1 on the sublane axis (-1 = pad)
    # uni_ref  : VMEM (1, V_pad) f32        -- already alpha0 * P_uni
    # bi_ref   : VMEM (V_pad, V_pad) f32    -- P(w | w_{t-1})
    # tri_hbm  : HBM  (V*V, V_pad) f32      -- P(w | w_{t-2}, w_{t-1}), row = w0*V + w1
    # out_ref  : VMEM (1, n_pad, V_pad) f32
    # tri_buf  : VMEM scratch (n_pad, V_pad) f32
    # sems     : DMA semaphores (n_pad,)
    b = pl.program_id(0)
    V_pad = uni_ref.shape[-1]
    n_tri = n_preds - 1                      # positions that have a trigram context

    # 1) data-dependent row gather of the trigram table (HBM -> VMEM), all in flight.
    # TODO(synk): for very long bptt (hundreds of predictions) switch this static
    #             unroll to a pl.loop with a small ring of semaphores.
    copies = []
    for j in range(n_tri):
        ctx = tok_smem[b, j] * V + tok_smem[b, j + 1]
        cp = pltpu.make_async_copy(tri_hbm.at[pl.ds(ctx, 1), :],
                                   tri_buf.at[pl.ds(j, 1), :],
                                   sems.at[j])
        cp.start()
        copies.append(cp)

    # rows with no trigram term (last prediction + sublane padding) are zero;
    # disjoint from the DMA target rows, so no ordering hazard.
    tri_buf[pl.ds(n_tri, n_pad - n_tri), :] = jnp.zeros(
        (n_pad - n_tri, V_pad), jnp.float32)

    # 2) unigram + bigram for the whole row in one MXU matmul while the gathers fly:
    #    one-hot(token_j) @ bigram selects bigram row tok[j] for every position.
    col_ids = jax.lax.broadcasted_iota(jnp.int32, (n_pad, V_pad), 1)
    onehot = (col_ids == tok_col_ref[0]).astype(jnp.float32)       # (n_pad, V_pad)
    acc = uni_ref[...] + a1 * jnp.dot(onehot, bi_ref[...],
                                      preferred_element_type=jnp.float32,
                                      precision=jax.lax.Precision.HIGHEST)

    # 3) wait for the gathered rows, fuse the trigram term, single dense store.
    for cp in copies:
        cp.wait()
    out_ref[0, :, :] = acc + a2 * tri_buf[...]


def linear_interp_trigram_forward(batch, unigram, bigram, trigram,
                                  alpha=(0.3, 0.5, 0.2)):
    B, L = batch.shape
    V = unigram.shape[-1]
    assert L >= 2
    assert bigram.shape == (V, V) and trigram.shape == (V * V, V)
    assert V < 46341, "ctx = w0*V + w1 would overflow int32"
    n_preds = L - 1                       # bptt_len - (n - 1) + 1 with n = 3

    # lane / sublane padding for dense tiles
    V_pad = ((V + 127) // 128) * 128
    n_pad = ((n_preds + 7) // 8) * 8

    # guard against out-of-range ids (Pallas does no VMEM bounds check)
    batch_i32 = jnp.clip(batch.astype(jnp.int32), 0, V - 1)

    pad_cols = ((0, 0), (0, V_pad - V))
    uni_scaled = jnp.pad((alpha[0] * unigram).astype(jnp.float32), pad_cols)
    bi_2d = jnp.pad(bigram.astype(jnp.float32),
                    ((0, V_pad - V), (0, V_pad - V)))           # (V_pad, V_pad), VMEM-resident
    tri_2d = jnp.pad(trigram.astype(jnp.float32), pad_cols)     # (V*V, V_pad), stays in HBM

    # tokens for the bigram one-hot, laid out along the sublane axis; -1 => zero row
    tok_col = batch_i32[:, :n_preds]
    if n_pad != n_preds:
        tok_col = jnp.pad(tok_col, ((0, 0), (0, n_pad - n_preds)),
                          constant_values=-1)
    tok_col = tok_col.reshape(B, n_pad, 1)

    kernel = functools.partial(_interp_kernel, n_preds, n_pad, V,
                               float(alpha[1]), float(alpha[2]))

    grid_spec = pltpu.PrefetchScalarGridSpec(
        num_scalar_prefetch=1,
        grid=(B,),
        in_specs=[
            pl.BlockSpec((1, n_pad, 1), lambda b, tok: (b, 0, 0)),   # tok_col
            pl.BlockSpec((1, V_pad), lambda b, tok: (0, 0)),         # alpha0 * unigram
            pl.BlockSpec((V_pad, V_pad), lambda b, tok: (0, 0)),     # bigram (VMEM-cached)
            pl.BlockSpec(memory_space=pl.ANY),                       # trigram (HBM, row-gathered)
        ],
        out_specs=pl.BlockSpec((1, n_pad, V_pad), lambda b, tok: (b, 0, 0)),
        scratch_shapes=[pltpu.VMEM((n_pad, V_pad), jnp.float32),
                        pltpu.SemaphoreType.DMA((n_pad,))],
    )

    cost = pl.CostEstimate(
        flops=2 * B * n_pad * V_pad * V_pad + 4 * B * n_pad * V_pad,
        transcendentals=0,
        bytes_accessed=int(4 * (V_pad * V_pad + V_pad                # resident tables
                                + B * L + B * n_pad                  # token ids
                                + B * (n_preds - 1) * V_pad          # gathered trigram rows
                                + B * n_pad * V_pad)),               # outputs
    )

    out = pl.pallas_call(
        kernel,
        out_shape=jax.ShapeDtypeStruct((B, n_pad, V_pad), jnp.float32),
        grid_spec=grid_spec,
        compiler_params=pltpu.CompilerParams(
            dimension_semantics=("parallel",),   # only the 64 KiB bigram block is duplicated per TC
        ),
        cost_estimate=cost,
    )(batch_i32, tok_col, uni_scaled, bi_2d, tri_2d)

    outputs = out[:, :n_preds, :V]
    # glue: targets are just the tokens shifted by the trigram context length
    targets = batch_i32[:, 2:]                   # (B, n_preds - 1)
    return outputs, targets


def _reference(batch, unigram, bigram, trigram, alpha):
    # pure-JAX reference of the same forward pass
    B, L = batch.shape
    V = unigram.shape[-1]
    n_preds = L - 1
    out = jnp.broadcast_to(alpha[0] * unigram[0], (B, n_preds, V)).astype(jnp.float32)
    out = out + alpha[1] * bigram[batch[:, :n_preds]]
    ctx2 = batch[:, : n_preds - 1] * V + batch[:, 1:n_preds]
    out = out.at[:, : n_preds - 1, :].add(alpha[2] * trigram[ctx2])
    return out


if __name__ == "__main__":
    V = 128     # vocabulary size
    B = 2       # batch_size
    L = 8       # bptt_len
    alpha = (0.3, 0.5, 0.2)

    key = jax.random.PRNGKey(0)
    k_uni, k_bi, k_tri, k_tok = jax.random.split(key, 4)

    # deterministic synthetic "counts", normalized per context
    # (stands in for get_counts + normalize_counts)
    uni_c = jax.random.uniform(k_uni, (1, V), jnp.float32) + 0.1
    unigram = uni_c / jnp.sum(uni_c, axis=-1, keepdims=True)

    bi_c = jax.random.uniform(k_bi, (V, V), jnp.float32) + 0.1
    bigram = bi_c / jnp.sum(bi_c, axis=-1, keepdims=True)

    tri_c = jax.random.uniform(k_tri, (V * V, V), jnp.float32) + 0.1
    trigram = tri_c / jnp.sum(tri_c, axis=-1, keepdims=True)

    batch = jax.random.randint(k_tok, (B, L), 0, V, dtype=jnp.int32)

    outputs, targets = linear_interp_trigram_forward(
        batch, unigram, bigram, trigram, alpha)
    outputs = jax.block_until_ready(outputs)
    targets = jax.block_until_ready(targets)

    ref = _reference(batch, unigram, bigram, trigram, alpha)
    assert outputs.shape == (B, L - 1, V)
    assert targets.shape == (B, L - 2)
    assert jnp.allclose(outputs, ref, rtol=1e-4, atol=5e-5)
    assert jnp.array_equal(targets, batch[:, 2:])
    print("KERNEL_OK")
</pallas_src>

<mosaic_0001>
module attributes {stable_mosaic.version = 11 : i64} {
  func.func @_interp_kernel(%arg0: i32, %arg1: memref<2x8xi32, #tpu.memory_space<smem>>, %arg2: memref<1x8x1xi32, #tpu.memory_space<vmem>>, %arg3: memref<1x128xf32, #tpu.memory_space<vmem>>, %arg4: memref<128x128xf32, #tpu.memory_space<vmem>>, %arg5: memref<16384x128xf32, #tpu.memory_space<any>>, %arg6: memref<1x8x128xf32, #tpu.memory_space<vmem>>, %arg7: memref<8x128xf32, #tpu.memory_space<vmem>>, %arg8: memref<8x!tpu.dma_semaphore, #tpu.memory_space<semaphore_mem>>) attributes {dimension_semantics = [#tpu.dimension_semantics<parallel>], iteration_bounds = array<i64: 2>, scalar_prefetch = 1 : i64, scratch_operands = 2 : i64, tpu.core_type = #tpu.core_type<tc>, window_params = [{transform_indices = @transform_0, window_bounds = array<i64: 1, 8, 1>}, {pipeline_mode = #tpu.pipeline_mode<synchronous>, transform_indices = @transform_1, window_bounds = array<i64: 1, 128>}, {pipeline_mode = #tpu.pipeline_mode<synchronous>, transform_indices = @transform_2, window_bounds = array<i64: 128, 128>}, {}, {transform_indices = @transform_4, window_bounds = array<i64: 1, 8, 128>}]} {
    %0 = arith.index_cast %arg0 : i32 to index
    %c0 = arith.constant 0 : index
    %1 = memref.load %arg1[%0, %c0] : memref<2x8xi32, #tpu.memory_space<smem>>
    %c128_i32 = arith.constant 128 : i32
    %2 = arith.muli %1, %c128_i32 : i32
    %3 = arith.index_cast %arg0 : i32 to index
    %c1 = arith.constant 1 : index
    %4 = memref.load %arg1[%3, %c1] : memref<2x8xi32, #tpu.memory_space<smem>>
    %5 = arith.addi %2, %4 : i32
    %c0_i32 = arith.constant 0 : i32
    %c0_i32_0 = arith.constant 0 : i32
    %6 = tpu.memref_slice %arg5[%5, %c0_i32_0] : memref<16384x128xf32, #tpu.memory_space<any>> -> memref<1x128xf32, #tpu.memory_space<any>>
    %c0_i32_1 = arith.constant 0 : i32
    %c0_i32_2 = arith.constant 0 : i32
    %7 = tpu.memref_slice %arg7[%c0_i32_1, %c0_i32_2] : memref<8x128xf32, #tpu.memory_space<vmem>> -> memref<1x128xf32, #tpu.memory_space<vmem>>
    %8 = tpu.memref_slice %arg8[%c0_i32] : memref<8x!tpu.dma_semaphore, #tpu.memory_space<semaphore_mem>> -> memref<1x!tpu.dma_semaphore, #tpu.memory_space<semaphore_mem>>
    %9 = tpu.memref_squeeze %8 : memref<1x!tpu.dma_semaphore, #tpu.memory_space<semaphore_mem>> -> memref<!tpu.dma_semaphore, #tpu.memory_space<semaphore_mem>>
    tpu.enqueue_dma source(%6 : memref<1x128xf32, #tpu.memory_space<any>>) target(%7 : memref<1x128xf32, #tpu.memory_space<vmem>>) target_semaphore(%9 : memref<!tpu.dma_semaphore, #tpu.memory_space<semaphore_mem>>)
    %10 = arith.index_cast %arg0 : i32 to index
    %c1_3 = arith.constant 1 : index
    %11 = memref.load %arg1[%10, %c1_3] : memref<2x8xi32, #tpu.memory_space<smem>>
    %c128_i32_4 = arith.constant 128 : i32
    %12 = arith.muli %11, %c128_i32_4 : i32
    %13 = arith.index_cast %arg0 : i32 to index
    %c2 = arith.constant 2 : index
    %14 = memref.load %arg1[%13, %c2] : memref<2x8xi32, #tpu.memory_space<smem>>
    %15 = arith.addi %12, %14 : i32
    %c1_i32 = arith.constant 1 : i32
    %c0_i32_5 = arith.constant 0 : i32
    %16 = tpu.memref_slice %arg5[%15, %c0_i32_5] : memref<16384x128xf32, #tpu.memory_space<any>> -> memref<1x128xf32, #tpu.memory_space<any>>
    %c1_i32_6 = arith.constant 1 : i32
    %c0_i32_7 = arith.constant 0 : i32
    %17 = tpu.memref_slice %arg7[%c1_i32_6, %c0_i32_7] : memref<8x128xf32, #tpu.memory_space<vmem>> -> memref<1x128xf32, #tpu.memory_space<vmem>>
    %18 = tpu.memref_slice %arg8[%c1_i32] : memref<8x!tpu.dma_semaphore, #tpu.memory_space<semaphore_mem>> -> memref<1x!tpu.dma_semaphore, #tpu.memory_space<semaphore_mem>>
    %19 = tpu.memref_squeeze %18 : memref<1x!tpu.dma_semaphore, #tpu.memory_space<semaphore_mem>> -> memref<!tpu.dma_semaphore, #tpu.memory_space<semaphore_mem>>
    tpu.enqueue_dma source(%16 : memref<1x128xf32, #tpu.memory_space<any>>) target(%17 : memref<1x128xf32, #tpu.memory_space<vmem>>) target_semaphore(%19 : memref<!tpu.dma_semaphore, #tpu.memory_space<semaphore_mem>>)
    %20 = arith.index_cast %arg0 : i32 to index
    %c2_8 = arith.constant 2 : index
    %21 = memref.load %arg1[%20, %c2_8] : memref<2x8xi32, #tpu.memory_space<smem>>
    %c128_i32_9 = arith.constant 128 : i32
    %22 = arith.muli %21, %c128_i32_9 : i32
    %23 = arith.index_cast %arg0 : i32 to index
    %c3 = arith.constant 3 : index
    %24 = memref.load %arg1[%23, %c3] : memref<2x8xi32, #tpu.memory_space<smem>>
    %25 = arith.addi %22, %24 : i32
    %c2_i32 = arith.constant 2 : i32
    %c0_i32_10 = arith.constant 0 : i32
    %26 = tpu.memref_slice %arg5[%25, %c0_i32_10] : memref<16384x128xf32, #tpu.memory_space<any>> -> memref<1x128xf32, #tpu.memory_space<any>>
    %c2_i32_11 = arith.constant 2 : i32
    %c0_i32_12 = arith.constant 0 : i32
    %27 = tpu.memref_slice %arg7[%c2_i32_11, %c0_i32_12] : memref<8x128xf32, #tpu.memory_space<vmem>> -> memref<1x128xf32, #tpu.memory_space<vmem>>
    %28 = tpu.memref_slice %arg8[%c2_i32] : memref<8x!tpu.dma_semaphore, #tpu.memory_space<semaphore_mem>> -> memref<1x!tpu.dma_semaphore, #tpu.memory_space<semaphore_mem>>
    %29 = tpu.memref_squeeze %28 : memref<1x!tpu.dma_semaphore, #tpu.memory_space<semaphore_mem>> -> memref<!tpu.dma_semaphore, #tpu.memory_space<semaphore_mem>>
    tpu.enqueue_dma source(%26 : memref<1x128xf32, #tpu.memory_space<any>>) target(%27 : memref<1x128xf32, #tpu.memory_space<vmem>>) target_semaphore(%29 : memref<!tpu.dma_semaphore, #tpu.memory_space<semaphore_mem>>)
    %30 = arith.index_cast %arg0 : i32 to index
    %c3_13 = arith.constant 3 : index
    %31 = memref.load %arg1[%30, %c3_13] : memref<2x8xi32, #tpu.memory_space<smem>>
    %c128_i32_14 = arith.constant 128 : i32
    %32 = arith.muli %31, %c128_i32_14 : i32
    %33 = arith.index_cast %arg0 : i32 to index
    %c4 = arith.constant 4 : index
    %34 = memref.load %arg1[%33, %c4] : memref<2x8xi32, #tpu.memory_space<smem>>
    %35 = arith.addi %32, %34 : i32
    %c3_i32 = arith.constant 3 : i32
    %c0_i32_15 = arith.constant 0 : i32
    %36 = tpu.memref_slice %arg5[%35, %c0_i32_15] : memref<16384x128xf32, #tpu.memory_space<any>> -> memref<1x128xf32, #tpu.memory_space<any>>
    %c3_i32_16 = arith.constant 3 : i32
    %c0_i32_17 = arith.constant 0 : i32
    %37 = tpu.memref_slice %arg7[%c3_i32_16, %c0_i32_17] : memref<8x128xf32, #tpu.memory_space<vmem>> -> memref<1x128xf32, #tpu.memory_space<vmem>>
    %38 = tpu.memref_slice %arg8[%c3_i32] : memref<8x!tpu.dma_semaphore, #tpu.memory_space<semaphore_mem>> -> memref<1x!tpu.dma_semaphore, #tpu.memory_space<semaphore_mem>>
    %39 = tpu.memref_squeeze %38 : memref<1x!tpu.dma_semaphore, #tpu.memory_space<semaphore_mem>> -> memref<!tpu.dma_semaphore, #tpu.memory_space<semaphore_mem>>
    tpu.enqueue_dma source(%36 : memref<1x128xf32, #tpu.memory_space<any>>) target(%37 : memref<1x128xf32, #tpu.memory_space<vmem>>) target_semaphore(%39 : memref<!tpu.dma_semaphore, #tpu.memory_space<semaphore_mem>>)
    %40 = arith.index_cast %arg0 : i32 to index
    %c4_18 = arith.constant 4 : index
    %41 = memref.load %arg1[%40, %c4_18] : memref<2x8xi32, #tpu.memory_space<smem>>
    %c128_i32_19 = arith.constant 128 : i32
    %42 = arith.muli %41, %c128_i32_19 : i32
    %43 = arith.index_cast %arg0 : i32 to index
    %c5 = arith.constant 5 : index
    %44 = memref.load %arg1[%43, %c5] : memref<2x8xi32, #tpu.memory_space<smem>>
    %45 = arith.addi %42, %44 : i32
    %c4_i32 = arith.constant 4 : i32
    %c0_i32_20 = arith.constant 0 : i32
    %46 = tpu.memref_slice %arg5[%45, %c0_i32_20] : memref<16384x128xf32, #tpu.memory_space<any>> -> memref<1x128xf32, #tpu.memory_space<any>>
    %c4_i32_21 = arith.constant 4 : i32
    %c0_i32_22 = arith.constant 0 : i32
    %47 = tpu.memref_slice %arg7[%c4_i32_21, %c0_i32_22] : memref<8x128xf32, #tpu.memory_space<vmem>> -> memref<1x128xf32, #tpu.memory_space<vmem>>
    %48 = tpu.memref_slice %arg8[%c4_i32] : memref<8x!tpu.dma_semaphore, #tpu.memory_space<semaphore_mem>> -> memref<1x!tpu.dma_semaphore, #tpu.memory_space<semaphore_mem>>
    %49 = tpu.memref_squeeze %48 : memref<1x!tpu.dma_semaphore, #tpu.memory_space<semaphore_mem>> -> memref<!tpu.dma_semaphore, #tpu.memory_space<semaphore_mem>>
    tpu.enqueue_dma source(%46 : memref<1x128xf32, #tpu.memory_space<any>>) target(%47 : memref<1x128xf32, #tpu.memory_space<vmem>>) target_semaphore(%49 : memref<!tpu.dma_semaphore, #tpu.memory_space<semaphore_mem>>)
    %50 = arith.index_cast %arg0 : i32 to index
    %c5_23 = arith.constant 5 : index
    %51 = memref.load %arg1[%50, %c5_23] : memref<2x8xi32, #tpu.memory_space<smem>>
    %c128_i32_24 = arith.constant 128 : i32
    %52 = arith.muli %51, %c128_i32_24 : i32
    %53 = arith.index_cast %arg0 : i32 to index
    %c6 = arith.constant 6 : index
    %54 = memref.load %arg1[%53, %c6] : memref<2x8xi32, #tpu.memory_space<smem>>
    %55 = arith.addi %52, %54 : i32
    %c5_i32 = arith.constant 5 : i32
    %c0_i32_25 = arith.constant 0 : i32
    %56 = tpu.memref_slice %arg5[%55, %c0_i32_25] : memref<16384x128xf32, #tpu.memory_space<any>> -> memref<1x128xf32, #tpu.memory_space<any>>
    %c5_i32_26 = arith.constant 5 : i32
    %c0_i32_27 = arith.constant 0 : i32
    %57 = tpu.memref_slice %arg7[%c5_i32_26, %c0_i32_27] : memref<8x128xf32, #tpu.memory_space<vmem>> -> memref<1x128xf32, #tpu.memory_space<vmem>>
    %58 = tpu.memref_slice %arg8[%c5_i32] : memref<8x!tpu.dma_semaphore, #tpu.memory_space<semaphore_mem>> -> memref<1x!tpu.dma_semaphore, #tpu.memory_space<semaphore_mem>>
    %59 = tpu.memref_squeeze %58 : memref<1x!tpu.dma_semaphore, #tpu.memory_space<semaphore_mem>> -> memref<!tpu.dma_semaphore, #tpu.memory_space<semaphore_mem>>
    tpu.enqueue_dma source(%56 : memref<1x128xf32, #tpu.memory_space<any>>) target(%57 : memref<1x128xf32, #tpu.memory_space<vmem>>) target_semaphore(%59 : memref<!tpu.dma_semaphore, #tpu.memory_space<semaphore_mem>>)
    %cst = arith.constant 0.000000e+00 : f32
    %60 = vector.broadcast %cst : f32 to vector<2x128xf32>
    %c6_28 = arith.constant 6 : index
    %c0_29 = arith.constant 0 : index
    %61 = vector.load %arg7[%c6_28, %c0_29] : memref<8x128xf32, #tpu.memory_space<vmem>>, vector<2x128xf32>
    tpu.vector_store %arg7[%c6_28, %c0_29], %60 {strides = array<i32>} : memref<8x128xf32, #tpu.memory_space<vmem>>, vector<2x128xf32>,
    %62 = tpu.iota {dimensions = array<i32: 1>} : vector<8x128xi32>
    %c0_30 = arith.constant 0 : index
    %c0_31 = arith.constant 0 : index
    %c0_32 = arith.constant 0 : index
    %63 = vector.load %arg2[%c0_30, %c0_31, %c0_32] : memref<1x8x1xi32, #tpu.memory_space<vmem>>, vector<1x8x1xi32>
    %64 = vector.shape_cast %63 : vector<1x8x1xi32> to vector<8x1xi32>
    %65 = vector.broadcast %64 : vector<8x1xi32> to vector<8x128xi32>
    %66 = arith.cmpi eq, %62, %65 : vector<8x128xi32>
    %67 = arith.extui %66 : vector<8x128xi1> to vector<8x128xi32>
    %68 = arith.sitofp %67 : vector<8x128xi32> to vector<8x128xf32>
    %c0_33 = arith.constant 0 : index
    %c0_34 = arith.constant 0 : index
    %69 = vector.load %arg3[%c0_33, %c0_34] : memref<1x128xf32, #tpu.memory_space<vmem>>, vector<1x128xf32>
    %c0_35 = arith.constant 0 : index
    %c0_36 = arith.constant 0 : index
    %70 = vector.load %arg4[%c0_35, %c0_36] : memref<128x128xf32, #tpu.memory_space<vmem>>, vector<128x128xf32>
    %cst_37 = arith.constant dense<0.000000e+00> : vector<8x128xf32>
    %71 = tpu.matmul %68, %70, %cst_37 {dimension_numbers = #tpu.dot_dimension_numbers<[1], [0], [0], [1], [0, 0, 1, 1], [], []>, precision = #tpu.contract_precision<fp32>} : vector<8x128xf32>, vector<128x128xf32>, vector<8x128xf32> -> vector<8x128xf32>
    %cst_38 = arith.constant 5.000000e-01 : f32
    %72 = vector.broadcast %cst_38 : f32 to vector<8x128xf32>
    %73 = arith.mulf %72, %71 : vector<8x128xf32>
    %74 = vector.broadcast %69 : vector<1x128xf32> to vector<8x128xf32>
    %75 = arith.addf %74, %73 : vector<8x128xf32>
    %c0_i32_39 = arith.constant 0 : i32
    %c0_i32_40 = arith.constant 0 : i32
    %76 = tpu.memref_slice %arg5[%5, %c0_i32_40] : memref<16384x128xf32, #tpu.memory_space<any>> -> memref<1x128xf32, #tpu.memory_space<any>>
    %c0_i32_41 = arith.constant 0 : i32
    %c0_i32_42 = arith.constant 0 : i32
    %77 = tpu.memref_slice %arg7[%c0_i32_41, %c0_i32_42] : memref<8x128xf32, #tpu.memory_space<vmem>> -> memref<1x128xf32, #tpu.memory_space<vmem>>
    %78 = tpu.memref_slice %arg8[%c0_i32_39] : memref<8x!tpu.dma_semaphore, #tpu.memory_space<semaphore_mem>> -> memref<1x!tpu.dma_semaphore, #tpu.memory_space<semaphore_mem>>
    %79 = tpu.memref_squeeze %78 : memref<1x!tpu.dma_semaphore, #tpu.memory_space<semaphore_mem>> -> memref<!tpu.dma_semaphore, #tpu.memory_space<semaphore_mem>>
    tpu.wait_dma2 semaphore(%79 : memref<!tpu.dma_semaphore, #tpu.memory_space<semaphore_mem>>) src(%76 : memref<1x128xf32, #tpu.memory_space<any>>) dst(%77 : memref<1x128xf32, #tpu.memory_space<vmem>>)
    %c1_i32_43 = arith.constant 1 : i32
    %c0_i32_44 = arith.constant 0 : i32
    %80 = tpu.memref_slice %arg5[%15, %c0_i32_44] : memref<16384x128xf32, #tpu.memory_space<any>> -> memref<1x128xf32, #tpu.memory_space<any>>
    %c1_i32_45 = arith.constant 1 : i32
    %c0_i32_46 = arith.constant 0 : i32
    %81 = tpu.memref_slice %arg7[%c1_i32_45, %c0_i32_46] : memref<8x128xf32, #tpu.memory_space<vmem>> -> memref<1x128xf32, #tpu.memory_space<vmem>>
    %82 = tpu.memref_slice %arg8[%c1_i32_43] : memref<8x!tpu.dma_semaphore, #tpu.memory_space<semaphore_mem>> -> memref<1x!tpu.dma_semaphore, #tpu.memory_space<semaphore_mem>>
    %83 = tpu.memref_squeeze %82 : memref<1x!tpu.dma_semaphore, #tpu.memory_space<semaphore_mem>> -> memref<!tpu.dma_semaphore, #tpu.memory_space<semaphore_mem>>
    tpu.wait_dma2 semaphore(%83 : memref<!tpu.dma_semaphore, #tpu.memory_space<semaphore_mem>>) src(%80 : memref<1x128xf32, #tpu.memory_space<any>>) dst(%81 : memref<1x128xf32, #tpu.memory_space<vmem>>)
    %c2_i32_47 = arith.constant 2 : i32
    %c0_i32_48 = arith.constant 0 : i32
    %84 = tpu.memref_slice %arg5[%25, %c0_i32_48] : memref<16384x128xf32, #tpu.memory_space<any>> -> memref<1x128xf32, #tpu.memory_space<any>>
    %c2_i32_49 = arith.constant 2 : i32
    %c0_i32_50 = arith.constant 0 : i32
    %85 = tpu.memref_slice %arg7[%c2_i32_49, %c0_i32_50] : memref<8x128xf32, #tpu.memory_space<vmem>> -> memref<1x128xf32, #tpu.memory_space<vmem>>
    %86 = tpu.memref_slice %arg8[%c2_i32_47] : memref<8x!tpu.dma_semaphore, #tpu.memory_space<semaphore_mem>> -> memref<1x!tpu.dma_semaphore, #tpu.memory_space<semaphore_mem>>
    %87 = tpu.memref_squeeze %86 : memref<1x!tpu.dma_semaphore, #tpu.memory_space<semaphore_mem>> -> memref<!tpu.dma_semaphore, #tpu.memory_space<semaphore_mem>>
    tpu.wait_dma2 semaphore(%87 : memref<!tpu.dma_semaphore, #tpu.memory_space<semaphore_mem>>) src(%84 : memref<1x128xf32, #tpu.memory_space<any>>) dst(%85 : memref<1x128xf32, #tpu.memory_space<vmem>>)
    %c3_i32_51 = arith.constant 3 : i32
    %c0_i32_52 = arith.constant 0 : i32
    %88 = tpu.memref_slice %arg5[%35, %c0_i32_52] : memref<16384x128xf32, #tpu.memory_space<any>> -> memref<1x128xf32, #tpu.memory_space<any>>
    %c3_i32_53 = arith.constant 3 : i32
    %c0_i32_54 = arith.constant 0 : i32
    %89 = tpu.memref_slice %arg7[%c3_i32_53, %c0_i32_54] : memref<8x128xf32, #tpu.memory_space<vmem>> -> memref<1x128xf32, #tpu.memory_space<vmem>>
    %90 = tpu.memref_slice %arg8[%c3_i32_51] : memref<8x!tpu.dma_semaphore, #tpu.memory_space<semaphore_mem>> -> memref<1x!tpu.dma_semaphore, #tpu.memory_space<semaphore_mem>>
    %91 = tpu.memref_squeeze %90 : memref<1x!tpu.dma_semaphore, #tpu.memory_space<semaphore_mem>> -> memref<!tpu.dma_semaphore, #tpu.memory_space<semaphore_mem>>
    tpu.wait_dma2 semaphore(%91 : memref<!tpu.dma_semaphore, #tpu.memory_space<semaphore_mem>>) src(%88 : memref<1x128xf32, #tpu.memory_space<any>>) dst(%89 : memref<1x128xf32, #tpu.memory_space<vmem>>)
    %c4_i32_55 = arith.constant 4 : i32
    %c0_i32_56 = arith.constant 0 : i32
    %92 = tpu.memref_slice %arg5[%45, %c0_i32_56] : memref<16384x128xf32, #tpu.memory_space<any>> -> memref<1x128xf32, #tpu.memory_space<any>>
    %c4_i32_57 = arith.constant 4 : i32
    %c0_i32_58 = arith.constant 0 : i32
    %93 = tpu.memref_slice %arg7[%c4_i32_57, %c0_i32_58] : memref<8x128xf32, #tpu.memory_space<vmem>> -> memref<1x128xf32, #tpu.memory_space<vmem>>
    %94 = tpu.memref_slice %arg8[%c4_i32_55] : memref<8x!tpu.dma_semaphore, #tpu.memory_space<semaphore_mem>> -> memref<1x!tpu.dma_semaphore, #tpu.memory_space<semaphore_mem>>
    %95 = tpu.memref_squeeze %94 : memref<1x!tpu.dma_semaphore, #tpu.memory_space<semaphore_mem>> -> memref<!tpu.dma_semaphore, #tpu.memory_space<semaphore_mem>>
    tpu.wait_dma2 semaphore(%95 : memref<!tpu.dma_semaphore, #tpu.memory_space<semaphore_mem>>) src(%92 : memref<1x128xf32, #tpu.memory_space<any>>) dst(%93 : memref<1x128xf32, #tpu.memory_space<vmem>>)
    %c5_i32_59 = arith.constant 5 : i32
    %c0_i32_60 = arith.constant 0 : i32
    %96 = tpu.memref_slice %arg5[%55, %c0_i32_60] : memref<16384x128xf32, #tpu.memory_space<any>> -> memref<1x128xf32, #tpu.memory_space<any>>
    %c5_i32_61 = arith.constant 5 : i32
    %c0_i32_62 = arith.constant 0 : i32
    %97 = tpu.memref_slice %arg7[%c5_i32_61, %c0_i32_62] : memref<8x128xf32, #tpu.memory_space<vmem>> -> memref<1x128xf32, #tpu.memory_space<vmem>>
    %98 = tpu.memref_slice %arg8[%c5_i32_59] : memref<8x!tpu.dma_semaphore, #tpu.memory_space<semaphore_mem>> -> memref<1x!tpu.dma_semaphore, #tpu.memory_space<semaphore_mem>>
    %99 = tpu.memref_squeeze %98 : memref<1x!tpu.dma_semaphore, #tpu.memory_space<semaphore_mem>> -> memref<!tpu.dma_semaphore, #tpu.memory_space<semaphore_mem>>
    tpu.wait_dma2 semaphore(%99 : memref<!tpu.dma_semaphore, #tpu.memory_space<semaphore_mem>>) src(%96 : memref<1x128xf32, #tpu.memory_space<any>>) dst(%97 : memref<1x128xf32, #tpu.memory_space<vmem>>)
    %c0_63 = arith.constant 0 : index
    %c0_64 = arith.constant 0 : index
    %100 = vector.load %arg7[%c0_63, %c0_64] : memref<8x128xf32, #tpu.memory_space<vmem>>, vector<8x128xf32>
    %cst_65 = arith.constant 2.000000e-01 : f32
    %101 = vector.broadcast %cst_65 : f32 to vector<8x128xf32>
    %102 = arith.mulf %101, %100 : vector<8x128xf32>
    %103 = arith.addf %75, %102 : vector<8x128xf32>
    %c0_66 = arith.constant 0 : index
    %c0_67 = arith.constant 0 : index
    %c0_68 = arith.constant 0 : index
    %104 = vector.load %arg6[%c0_66, %c0_67, %c0_68] : memref<1x8x128xf32, #tpu.memory_space<vmem>>, vector<1x8x128xf32>
    %105 = vector.shape_cast %104 : vector<1x8x128xf32> to vector<8x128xf32>
    %106 = vector.shape_cast %103 : vector<8x128xf32> to vector<1x8x128xf32>
    tpu.vector_store %arg6[%c0_66, %c0_67, %c0_68], %106 {strides = array<i32>} : memref<1x8x128xf32, #tpu.memory_space<vmem>>, vector<1x8x128xf32>,
    return
  }
  func.func @transform_0(%arg0: i32, %arg1: memref<2x8xi32, #tpu.memory_space<smem>>) -> (i32, i32, i32) {
    %c0_i32 = arith.constant 0 : i32
    %c0_i32_0 = arith.constant 0 : i32
    %c0_i32_1 = arith.constant 0 : i32
    return %arg0, %c0_i32, %c0_i32_0 : i32, i32, i32
  }
  func.func @transform_1(%arg0: i32, %arg1: memref<2x8xi32, #tpu.memory_space<smem>>) -> (i32, i32) {
    %c0_i32 = arith.constant 0 : i32
    %c0_i32_0 = arith.constant 0 : i32
    %c0_i32_1 = arith.constant 0 : i32
    return %c0_i32, %c0_i32_0 : i32, i32
  }
  func.func @transform_2(%arg0: i32, %arg1: memref<2x8xi32, #tpu.memory_space<smem>>) -> (i32, i32) {
    %c0_i32 = arith.constant 0 : i32
    %c0_i32_0 = arith.constant 0 : i32
    %c0_i32_1 = arith.constant 0 : i32
    return %c0_i32, %c0_i32_0 : i32, i32
  }
  func.func @transform_4(%arg0: i32, %arg1: memref<2x8xi32, #tpu.memory_space<smem>>) -> (i32, i32, i32) {
    %c0_i32 = arith.constant 0 : i32
    %c0_i32_0 = arith.constant 0 : i32
    %c0_i32_1 = arith.constant 0 : i32
    return %arg0, %c0_i32, %c0_i32_0 : i32, i32, i32
  }
}

</mosaic_0001>

<bundles_post_ra>
// kernel: tpu_custom_call.1
= control target key start
LH: loop header
LB: loop body
LE: loop exit
PB: predicated region body
PF: predicated region fallthrough
CT: control target
= control target key end

     0   :  { %s2725_s0 = inlined_call_operand.hbm [shape: s32[2,8], index: 0, kind: input, shape index: {}]   ;;  %s2726_s1 = inlined_call_operand.vmem [shape: s32[2,8,1], index: 1, kind: input, shape index: {}]   ;;  %s2727_s2 = inlined_call_operand.hbm [shape: f32[1,128], index: 2, kind: input, shape index: {}]   ;;  %s2728_s3 = inlined_call_operand.hbm [shape: f32[128,128], index: 3, kind: input, shape index: {}]   ;;  %s2729_s4 = inlined_call_operand.hbm [shape: f32[16384,128], index: 4, kind: input, shape index: {}]   ;;  %s2730_s5 = inlined_call_operand.hbm [shape: f32[2,8,128], index: 5, kind: output, shape index: {}]  }
   0x1   :  { %2740 = sst [smem:[#allocation40_spill]] %s2726_s1  ;;  %s1766_s20 = scalar_lea.hbm %s2725_s0, 32 }
   0x2   :  { %2741 = sst [smem:[#allocation41_spill]] %s2727_s2  ;;  %p1767_p0 = scmp.ne.s32.totalorder %s2725_s0, %s1766_s20 }
   0x3   :  { %2742 = sst [smem:[#allocation42_spill]] %s2728_s3  ;;  %p1770_p1 = scmp.lt.u32.totalorder %s1766_s20, %s2725_s0 }
   0x5   :  { %p1772_p2 = pnand %p1770_p1, %p1767_p0 }
   0x7   :  { %1775 = shalt.err (!%p1772_p2)  }
   0x8   :  { %s2062_s25 = smov [#allocation5]  }
   0x9   :  { %11 = dma.hbm_to_smem %s2725_s0, 32, %s2062_s25, [#allocation4] }
   0xa   :  { %2020 = dma.done.wait [#allocation4], 32 }
   0xb   :  { %2021 = vsyncadd [#allocation4], 4294967264 }
   0xc   :  { %13 = sfence }
   0xd   :  { %14 = vsyncpa [#allocation7], 0 }
   0xe   :  { %15 = vsyncpa [#allocation10], 0 }
   0xf   :  { %16 = vsyncpa [#allocation8], 0 }
  0x10   :  { %18 = vsyncpa [#allocation8 + $0x1], 0  ;;  %s2121_s28 = smov 0   ;;  %s2123_s29 = smov 0  }
  0x11   :  { %s2125_s30 = smov 0   ;;  %s2127_s6 = smov 0  }
  0x12 LB: > { %2743 = sst [smem:[#allocation36_spill]] %s2056_s30  ;;  %s2142_s0 = sadd.s32 4294967295, %s2060_s6   ;;  %s2060_s6 = sphi %s2127_s6, %s2766_s6   ;;  %s2056_s30 = sphi %s2125_s30, %s2768_s30   ;;  %s2052_s29 = sphi %s2123_s29, %s2770_s29   ;;  %s2048_s28 = sphi %s2121_s28, %s2769_s28  }
  0x13   : > { %s1186_s7 = sadd.s32 4294967294, %s2060_s6   ;;  %s2146_s8 = sadd.s32 1, %s2060_s6  }
  0x14   : > { %2744 = sst [smem:[#allocation37_spill]] %s2146_s8  ;;  %s99_s9 = sadd.s32 1, %s2056_s30 }
  0x15   : > { %s96_s10 = ssub.s32 %s2060_s6, %s2146_s8  ;;  %p109_p3 = scmp.ne.s32.totalorder %s2056_s30, %s2052_s29 }
  0x16   : > { %p97_p4 = scmp.eq.s32.totalorder %s96_s10, 0  ;;  %p110_p5 = scmp.eq.s32.totalorder %s2142_s0, 1 }
  0x17   : > { %p115_p6 = scmp.ne.s32.totalorder %s2052_s29, %s2048_s28  ;;  %p116_p7 = scmp.eq.s32.totalorder %s1186_s7, 1 }
  0x18   : > { %s2157_s11 = scalar_select %p97_p4, %s2056_s30, %s99_s9  }
  0x19   : > { %p2159_p8 = por %p110_p5, %p109_p3  ;;  %p2163_p9 = por %p116_p7, %p115_p6 }
  0x1a   : > { %2745 = sst [smem:[#allocation38_spill]] %s2157_s11  ;;  %p1187_p10 = scmp.ge.s32.totalorder %s2060_s6, 1 }
  0x1b   : > { %s2746_s12 = scalar_select %p2159_p8, 1, 0 }
  0x1c   : > { %s2747_s13 = scalar_select %p2163_p9, 1, 0 }
  0x1d   : > { %p123_p11 = scmp.lt.s32.totalorder %s2060_s6, 3  ;;  %p2731_p12 = scmp.eq.s32.totalorder %s2142_s0, 0 }
  0x1e   : > { %2748 = sst [smem:[#allocation39_spill]] %s2747_s13  ;;  %s2063_s15 = smov [#allocation6]  }
  0x1f   : > { %p2170_p13 = pnand %p1187_p10, %p123_p11  ;;  %s136_s16 = sshll.u32 %s2063_s15, 4  ;;  %s137_s16 = int_to_ptr.vmem [resolvable:$true] %s136_s16 }
  0x20   : > { %s2064_s17 = smov [#allocation9]   ;;  %s2751_s2 = sld [smem:[#allocation41_spill]] }
  0x21   : > { %s2749_s14 = scalar_select %p2170_p13, 1, 0 }
  0x22   : > { %p1701_p0 = pneg %p2170_p13  ;;  %s146_s18 = sshll.u32 %s2064_s17, 4  ;;  %s2182_s18 = int_to_ptr.vmem [resolvable:$true] %s146_s18 }
  0x24   : > { %p2178_p1 = pnand %p2731_p12, %p1701_p0 }
  0x26   : > { %s1776_s22 = scalar_lea.hbm %s2751_s2, 16  ;;  %p1778_p3 = pneg %p2178_p1 }
  0x27   : > { %p1777_p2 = scmp.ne.s32.totalorder %s2751_s2, %s1776_s22  ;;  %p1783_p6 = scmp.lt.u32.totalorder %s1776_s22, %s2751_s2 }
  0x29   : > { %p1779_p4 = pnand %p1778_p3, %p1777_p2 }
  0x2b   : > { %p1780_p5 = pneg %p1779_p4 }
  0x2d   : > { %p1785_p7 = pnand %p1783_p6, %p1780_p5 }
  0x2f   : > { %1788 = shalt.err (!%p1785_p7)
}
  0x30   : > { %s1789_s27 = scalar_lea.vmem %s137_s16, 16  ;;  %s1796_s7 = scalar_lea.vmem %s137_s16, 32 }
  0x31   : > { %p1790_p10 = scmp.ne.s32.totalorder %s137_s16, %s1789_s27  ;;  %p1797_p12 = scmp.lt.s32.totalorder %s137_s16, %s137_s16 }
  0x32   : > { %p1798_p9 = scmp.lt.s32.totalorder %s1796_s7, %s1789_s27 }
  0x33   : > { %p1792_p11 = pnand %p1790_p10, %p1778_p3 }
  0x34   : > { %p1799_p8 = por %p1798_p9, %p1797_p12 }
  0x35   : > { %p1793_p0 = pneg %p1792_p11 }
  0x37   : > { %p1800_p13 = pnand %p1799_p8, %p1793_p0 }
  0x39   : > { %1803 = shalt.err (!%p1800_p13)
}
  0x3a   : > { %1704 = dma.hbm_to_vmem [thread:$0]  (!%p2178_p1), %s2751_s2, 16, %s137_s16, [#allocation7]  }
  0x3b   : > { %s2752_s3 = sld [smem:[#allocation42_spill]] }
  0x41   : > { %s1804_s20 = scalar_lea.hbm %s2752_s3, 2048 }
  0x42   : > { %p1805_p2 = scmp.ne.s32.totalorder %s2752_s3, %s1804_s20  ;;  %p1811_p12 = scmp.lt.u32.totalorder %s1804_s20, %s2752_s3 }
  0x44   : > { %p1807_p9 = pnand %p1805_p2, %p1778_p3 }
  0x46   : > { %p1808_p8 = pneg %p1807_p9 }
  0x48   : > { %p1813_p13 = pnand %p1811_p12, %p1808_p8 }
  0x4a   : > { %1816 = shalt.err (!%p1813_p13)
}
  0x4b   : > { %s1817_s16 = scalar_lea.vmem %s2182_s18, 2048  ;;  %p1825_p7 = scmp.lt.s32.totalorder %s2182_s18, %s2182_s18 }
  0x4c   : > { %p1818_p4 = scmp.ne.s32.totalorder %s2182_s18, %s1817_s16  ;;  %p1826_p10 = scmp.lt.s32.totalorder %s1817_s16, %s1817_s16 }
  0x4e   : > { %p1820_p5 = pnand %p1818_p4, %p1778_p3  ;;  %p1827_p11 = por %p1826_p10, %p1825_p7 }
  0x50   : > { %p1821_p6 = pneg %p1820_p5 }
  0x52   : > { %p1828_p0 = pnand %p1827_p11, %p1821_p6 }
  0x54   : > { %1831 = shalt.err (!%p1828_p0)
}
  0x55   : > { %s2065_s25 = smov 128   ;;  %s2066_s26 = smov 8  }
  0x56   : > { %1707 = dma.hbm_to_vmem [thread:$0]  (!%p2178_p1), %s2752_s3, 2048, %s2182_s18, [#allocation10], %s2065_s25, %s2065_s25, %s2066_s26  }
  0x57   : > { %p2753_p2 = scmp.ne.s32.totalorder %s2749_s14, 0 }
  0x58   : > { %p2754_p3 = scmp.eq.s32.totalorder (!%p2753_p2), %s2142_s0, 0 }
  0x59   : > { %169 = sbr.rel (%p2753_p2) target bundleno = 563 (0x233), region = 32 }
  0x60   : > { %2023 = dma.done.wait (%p2754_p3), [#allocation7], 16   ;;  %p2755_p9 = pmov %p2754_p3 }
  0x61   : > { %p2756_p8 = pmov %p2754_p3 }
  0x62   : > { %2025 = vsyncadd (%p2755_p9), [#allocation7], 4294967280 }
  0x63   : > { %2027 = dma.done.wait (%p2756_p8), [#allocation10], 2048   ;;  %p2757_p12 = pmov %p2754_p3 }
  0x64   : > { %p196_p13 = scmp.lt.s32.totalorder %s2142_s0, 1  ;;  %v2067_v0 = vmov 0   ;;  %v2068_v1 = vmov 0.0|0.0   ;;  %s2758_s1 = sld [smem:[#allocation40_spill]]  ;;  %v330_v3 = vld [vmem:[#allocation9] sm:$0xff]  ;;  %v331_v4 = vld [vmem:[#allocation9 + $0x8] sm:$0xff] }
  0x65   : > { %2029 = vsyncadd (%p2757_p12), [#allocation10], 4294965248  ;;  %1765 = vset.pattern.permute.xlu0 %v2067_v0  ;;  %1610 = vmatprep.subr.bf16.mxu0 %v2068_v1  ;;  %v347_v5 = vand.u32 4294901760, %v330_v3  ;;  %v350_v6 = vand.u32 4294901760, %v331_v4  ;;  %v332_v7 = vld [vmem:[#allocation9 + $0x10] sm:$0xff]  ;;  %v333_v8 = vld [vmem:[#allocation9 + $0x18] sm:$0xff] }
  0x66   : > { %s197_s14 = scalar_select %p196_p13, %s2142_s0, 1  ;;  %1538 = vmatprep.subr.bf16.mxu1 %v2068_v1  ;;  %v334_v9 = vld [vmem:[#allocation9 + $0x20] sm:$0xff]  ;;  %v353_v10 = vand.u32 4294901760, %v332_v7  ;;  %v356_v11 = vand.u32 4294901760, %v333_v8  ;;  %v335_v12 = vld [vmem:[#allocation9 + $0x28] sm:$0xff]  ;;  %v336_v14 = vld [vmem:[#allocation9 + $0x30] sm:$0xff] }
  0x67   : > { %v359_v13 = vand.u32 4294901760, %v334_v9  ;;  %v337_v15 = vld [vmem:[#allocation9 + $0x38] sm:$0xff]  ;;  %v2248_v16 = vpack.c.bf16 %v350_v6, %v347_v5  ;;  %v2250_v17 = vsub.f32 %v330_v3, %v347_v5  ;;  %v2252_v18 = vsub.f32 %v331_v4, %v350_v6  ;;  %v2254_v20 = vld [vmem:[#allocation9 + $0x40] sm:$0xff]  ;;  %v2256_v21 = vld [vmem:[#allocation9 + $0x48] sm:$0xff]  ;;  %s2561_s15 = sshll.u32 %s2142_s0, 7  ;;  %s2735_s9 = sand.u32 1, %s2052_s29  }
  0x68   : > { %s1195_s18 = sshll.u32 %s197_s14, 3  ;;  %v362_v19 = vand.u32 4294901760, %v335_v12  ;;  %v2258_v22 = vld [vmem:[#allocation9 + $0x50] sm:$0xff]  ;;  %v2260_v23 = vsub.f32 %v332_v7, %v353_v10  ;;  %v2262_v24 = vsub.f32 %v333_v8, %v356_v11  ;;  %v2266_v26 = vld [vmem:[#allocation9 + $0x58] sm:$0xff]  ;;  %v2268_v27 = vld [vmem:[#allocation9 + $0x60] sm:$0xff]  ;;  %v2272_v28 = vpack.c.bf16 %v356_v11, %v353_v10  ;;  %s201_s17 = sld [smem:[#allocation5 + %s2561_s15]] }
  0x69   : > { %v2264_v25 = vsub.f32 %v334_v9, %v359_v13  ;;  %1612 = vmatpush3.bf16.msra.mxu0 %v2248_v16  ;;  %1540 = vmatpush3.bf16.msra.mxu1 %v2248_v16  ;;  %v365_v30 = vand.u32 4294901760, %v336_v14  ;;  %v368_v31 = vand.u32 4294901760, %v337_v15  ;;  %v371_v32 = vand.u32 4294901760, %v2254_v20  ;;  %v2281_v35 = vld [vmem:[#allocation9 + $0x68] sm:$0xff]  ;;  %v2289_v40 = vld [vmem:[#allocation9 + $0x70] sm:$0xff]  ;;  %v2291_v41 = vld [vmem:[#allocation9 + $0x78] sm:$0xff] }
  0x6a   : > { %s199_s10 = scalar_lea.vmem %s2758_s1, %s1195_s18  ;;  %v2274_v29 = vsub.f32 %v335_v12, %v362_v19  ;;  %1613 = vmatprep.subr.bf16.mxu0 %v2068_v1  ;;  %1541 = vmatprep.subr.bf16.mxu1 %v2068_v1  ;;  %v374_v33 = vand.u32 4294901760, %v2256_v21  ;;  %v377_v34 = vand.u32 4294901760, %v2258_v22  ;;  %v380_v38 = vand.u32 4294901760, %v2266_v26  ;;  %s203_s20 = sadd.s32 1, %s2561_s15 }
  0x6b   : > { %v322_v2 = vld [vmem:[%s199_s10] sm:$0xff]  ;;  %v2283_v36 = vsub.f32 %v336_v14, %v365_v30  ;;  %v2285_v37 = vsub.f32 %v337_v15, %v368_v31  ;;  %v383_v39 = vand.u32 4294901760, %v2268_v27  ;;  %v2293_v42 = vpack.c.bf16 %v362_v19, %v359_v13  ;;  %s204_s21 = sld [smem:[#allocation5 + %s203_s20]]  ;;  %s221_s23 = sadd.s32 2, %s2561_s15 }
  0x6c   : > { %324 = vperm.xlu0 %1765, %v322_v2   ;;  %v2296_v43 = vsub.f32 %v2254_v20, %v371_v32  ;;  %v2299_v44 = vsub.f32 %v2256_v21, %v374_v33  ;;  %v2306_v45 = vsub.f32 %v2258_v22, %v377_v34  ;;  %v2311_v46 = vsub.f32 %v2266_v26, %v380_v38  ;;  %s2565_s22 = sld [smem:[#allocation5 + %s203_s20]]  ;;  %s241_s24 = sadd.s32 3, %s2561_s15 }
  0x6d   : > { %1615 = vmatpush3.bf16.msra.mxu0 %v2272_v28  ;;  %1543 = vmatpush3.bf16.msra.mxu1 %v2272_v28  ;;  %v386_v47 = vand.u32 4294901760, %v2281_v35  ;;  %v2317_v48 = vsub.f32 %v2268_v27, %v383_v39  ;;  %v389_v49 = vand.u32 4294901760, %v2289_v40  ;;  %v392_v50 = vand.u32 4294901760, %v2291_v41  ;;  %s2569_s16 = sld [smem:[#allocation5 + %s221_s23]]  ;;  %s2734_s27 = sadd.s32 4, %s2561_s15 }
  0x6e   : > { %1616 = vmatprep.subr.bf16.mxu0 %v2068_v1  ;;  %1544 = vmatprep.subr.bf16.mxu1 %v2068_v1  ;;  %v440_v51 = vand.u32 4294901760, %v2250_v17  ;;  %vm2069_vm0 = vmmov 0   ;;  %v2070_v53 = vmov 0.0   ;;  %v447_v54 = vand.u32 4294901760, %v2252_v18  ;;  %s2571_s0 = sld [smem:[#allocation5 + %s221_s23]]  ;;  %s1197_s14 = sshll.u32 %s201_s17, 7 }
  0x6f   : > { %v2327_v52 = vsub.f32 %v2281_v35, %v386_v47  ;;  %1465 = vmatprep.mubr.msk.f32.mxu0 %vm2069_vm0, %v2070_v53  ;;  %1360 = vmatprep.mubr.msk.f32.mxu1 %vm2069_vm0, %v2070_v53  ;;  %v454_v55 = vand.u32 4294901760, %v2260_v23  ;;  %v2335_v56 = vpack.c.bf16 %v368_v31, %v365_v30  ;;  %v2340_v57 = vsub.f32 %v2289_v40, %v389_v49  ;;  %s2573_s25 = sld [smem:[#allocation5 + %s241_s24]]  ;;  %s2586_s20 = sshll.u32 %s2735_s9, 3 }
  0x70   : > { %v2345_v58 = vsub.f32 %v2291_v41, %v392_v50  ;;  %v441_v59 = vsub.f32 %v2250_v17, %v440_v51  ;;  %v2350_v60 = vpack.c.bf16 %v447_v54, %v440_v51  ;;  %v448_v61 = vsub.f32 %v2252_v18, %v447_v54  ;;  %s2575_s26 = sld [smem:[#allocation5 + %s241_s24]]  ;;  %s2072_s3 = smov [#allocation2]  }
  0x71   : > { %1618 = vmatpush3.bf16.msra.mxu0 %v2293_v42  ;;  %1546 = vmatpush3.bf16.msra.mxu1 %v2293_v42  ;;  %v461_v62 = vand.u32 4294901760, %v2262_v24  ;;  %v455_v63 = vsub.f32 %v2260_v23, %v454_v55  ;;  %v468_v2 = vand.u32 4294901760, %v2264_v25  ;;  %v475_v3 = vand.u32 4294901760, %v2274_v29  ;;  %s2581_s18 = sld [smem:[#allocation5 + %s2734_s27]]  ;;  %s205_s19 = sadd.s32 %s1197_s14, %s204_s21 }
  0x72   : > { %1619 = vmatprep.subr.bf16.mxu0 %v2068_v1  ;;  %1547 = vmatprep.subr.bf16.mxu1 %v2068_v1  ;;  %v442_v0 = vand.u32 4294901760, %v441_v59  ;;  %v449_v4 = vand.u32 4294901760, %v448_v61  ;;  %v482_v11 = vand.u32 4294901760, %v2283_v36  ;;  %v2369_v12 = vpack.c.bf16 %v374_v33, %v371_v32  ;;  %s1198_s10 = sshll.u32 %s205_s19, 4  ;;  %s215_s11 = sshll.u32 %s2072_s3, 4  ;;  %s2591_s11 = int_to_ptr.vmem [resolvable:$true] %s215_s11 }
  0x73   : > { %v2359_v5 = vpack.c.bf16 %v461_v62, %v454_v55  ;;  %v456_v6 = vand.u32 4294901760, %v455_v63  ;;  %v462_v7 = vsub.f32 %v2262_v24, %v461_v62  ;;  %v2362_v8 = vpack.c.bf16 %v475_v3, %v468_v2  ;;  %s207_s23 = scalar_lea.hbm %s2729_s4, %s1198_s10  ;;  %s1199_s24 = sshll.u32 %s2565_s22, 7 }
  0x74   : > { %v469_v9 = vsub.f32 %v2264_v25, %v468_v2  ;;  %v476_v10 = vsub.f32 %v2274_v29, %v475_v3  ;;  %v2371_v13 = vpack.c.bf16 %v449_v4, %v442_v0  ;;  %v489_v15 = vand.u32 4294901760, %v2285_v37  ;;  %s1832_s7 = scalar_lea.hbm %s207_s23, 16  ;;  %s2597_s21 = scalar_lea.hbm %s2729_s4, 262144 }
  0x75   : > { %1621 = vmatpush3.bf16.msra.mxu0 %v2335_v56  ;;  %1549 = vmatpush3.bf16.msra.mxu1 %v2335_v56  ;;  %v463_v14 = vand.u32 4294901760, %v462_v7  ;;  %v483_v21 = vsub.f32 %v2283_v36, %v482_v11  ;;  %v496_v54 = vand.u32 4294901760, %v2296_v43  ;;  %v503_v55 = vand.u32 4294901760, %v2299_v44  ;;  %p1833_p1 = scmp.ne.s32.totalorder %s207_s23, %s1832_s7  ;;  %p1835_p4 = scmp.lt.u32.totalorder %s207_s23, %s2729_s4 }
  0x76   : > { %1622 = vmatprep.subr.bf16.mxu0 %v2068_v1  ;;  %1550 = vmatprep.subr.bf16.mxu1 %v2068_v1  ;;  %v470_v19 = vand.u32 4294901760, %v469_v9  ;;  %v477_v20 = vand.u32 4294901760, %v476_v10  ;;  %v2379_v31 = vpack.c.bf16 %v489_v15, %v482_v11  ;;  %v490_v32 = vsub.f32 %v2285_v37, %v489_v15  ;;  %p1836_p5 = scmp.lt.u32.totalorder %s2597_s21, %s1832_s7  ;;  %p1838_p7 = scmp.lt.u32.totalorder %s1832_s7, %s207_s23 }
  0x77   : > { %v2377_v30 = vpack.c.bf16 %v463_v14, %v456_v6  ;;  %v484_v51 = vand.u32 4294901760, %v483_v21  ;;  %v2392_v59 = vpack.c.bf16 %v380_v38, %v377_v34  ;;  %v2396_v62 = vpack.c.bf16 %v503_v55, %v496_v54 }
  0x78   : > { %v2382_v33 = vpack.c.bf16 %v477_v20, %v470_v19  ;;  %v491_v61 = vand.u32 4294901760, %v490_v32  ;;  %v497_v63 = vsub.f32 %v2296_v43, %v496_v54  ;;  %v504_v0 = vsub.f32 %v2299_v44, %v503_v55  ;;  %p1837_p6 = por %p1836_p5, %p1835_p4 }
  0x79   : > { %1624 = vmatpush3.bf16.msra.mxu0 %v2369_v12  ;;  %1552 = vmatpush3.bf16.msra.mxu1 %v2369_v12  ;;  %v510_v22 = vand.u32 4294901760, %v2306_v45  ;;  %v517_v26 = vand.u32 4294901760, %v2311_v46  ;;  %v2410_v34 = vpack.c.bf16 %v386_v47, %v383_v39  ;;  %v524_v11 = vand.u32 4294901760, %v2317_v48 }
  0x7a   : > { %1625 = vmatprep.subr.bf16.mxu0 %v2068_v1  ;;  %1553 = vmatprep.subr.bf16.mxu1 %v2068_v1  ;;  %v2400_v2 = vpack.c.bf16 %v491_v61, %v484_v51  ;;  %v498_v3 = vand.u32 4294901760, %v497_v63  ;;  %v505_v4 = vand.u32 4294901760, %v504_v0  ;;  %v531_v27 = vand.u32 4294901760, %v2327_v52  ;;  %p1839_p10 = por %p1838_p7, %p1837_p6 }
  0x7b   : > { %v2416_v6 = vpack.c.bf16 %v517_v26, %v510_v22  ;;  %v511_v7 = vsub.f32 %v2306_v45, %v510_v22  ;;  %v518_v9 = vsub.f32 %v2311_v46, %v517_v26  ;;  %v2428_v35 = vpack.c.bf16 %v392_v50, %v389_v49 }
  0x7c   : > { %v2414_v38 = vpack.c.bf16 %v505_v4, %v498_v3  ;;  %v1653_v47 = vpack.c.bf16 %v531_v27, %v524_v11  ;;  %v525_v14 = vsub.f32 %v2317_v48, %v524_v11  ;;  %v532_v15 = vsub.f32 %v2327_v52, %v531_v27  ;;  %p1840_p11 = pnand %p1839_p10, %p1833_p1 }
  0x7d   : > { %1627 = vmatpush3.bf16.msra.mxu0 %v2392_v59  ;;  %1555 = vmatpush3.bf16.msra.mxu1 %v2392_v59  ;;  %v512_v10 = vand.u32 4294901760, %v511_v7  ;;  %v519_v39 = vand.u32 4294901760, %v518_v9  ;;  %v538_v32 = vand.u32 4294901760, %v2340_v57  ;;  %v545_v40 = vand.u32 4294901760, %v2345_v58 }
  0x7e   : > { %1628 = vmatprep.subr.bf16.mxu0 %v2068_v1  ;;  %1556 = vmatprep.subr.bf16.mxu1 %v2068_v1  ;;  %v526_v20 = vand.u32 4294901760, %v525_v14  ;;  %v533_v21 = vand.u32 4294901760, %v532_v15  ;;  %v1587_v63 = vpack.c.bf16 %v2252_v18, %v2250_v17  ;;  %v1590_v0 = vpack.c.bf16 %v2262_v24, %v2260_v23 }
  0x7f   : > { %v1578_v19 = vpack.c.bf16 %v519_v39, %v512_v10  ;;  %v1656_v49 = vpack.c.bf16 %v545_v40, %v538_v32  ;;  %v539_v50 = vsub.f32 %v2340_v57, %v538_v32  ;;  %v546_v51 = vsub.f32 %v2345_v58, %v545_v40 }
  0x80   : > { %v1581_v41 = vpack.c.bf16 %v533_v21, %v526_v20  ;;  %v1593_v3 = vpack.c.bf16 %v2274_v29, %v2264_v25  ;;  %v1596_v4 = vpack.c.bf16 %v2285_v37, %v2283_v36  ;;  %v1599_v22 = vpack.c.bf16 %v2299_v44, %v2296_v43 }
  0x81   : > { %1630 = vmatpush3.bf16.msra.mxu0 %v2410_v34  ;;  %1558 = vmatpush3.bf16.msra.mxu1 %v2410_v34  ;;  %v540_v54 = vand.u32 4294901760, %v539_v50  ;;  %v547_v55 = vand.u32 4294901760, %v546_v51  ;;  %v1602_v26 = vpack.c.bf16 %v2311_v46, %v2306_v45  ;;  %v1605_v7 = vpack.c.bf16 %v2327_v52, %v2317_v48 }
  0x82   : > { %1631 = vmatprep.subr.bf16.mxu0 %v2068_v1  ;;  %1559 = vmatprep.subr.bf16.mxu1 %v2068_v1  ;;  %v1608_v17 = vpack.c.bf16 %v2345_v58, %v2340_v57  ;;  %v320_v18 = vlaneseq }
  0x83   : > { %v1584_v61 = vpack.c.bf16 %v547_v55, %v540_v54 }
  0x84   : > { %v2458_v9 = vand.u32 127, %v320_v18 }
  0x85   : > { %1633 = vmatpush3.bf16.msra.mxu0 %v2428_v35  ;;  %1561 = vmatpush3.bf16.msra.mxu1 %v2428_v35 }
  0x86   : > { %1634 = vmatprep.subr.bf16.mxu0 %v2068_v1  ;;  %1562 = vmatprep.subr.bf16.mxu1 %v2068_v1 }
  0xeb   : > { %v2460_v10 = vpop.permute.xlu0 %324 }
  0xec   : > { %vm326_vm1 = vcmp.eq.s32.totalorder %v2458_v9, %v2460_v10 }
  0xed   : > { %v1209_v11 = vsel %vm326_vm1, 1.0, %v2070_v53 }
  0xee   : > { %v2468_v27 = vsub.f32 %v1209_v11, %v1209_v11 }
  0xf0   : > { %v429_v39 = vand.u32 4294901760, %v2468_v27 }
  0xf2   : > { %1466 = vmatmul.mubr.f32.vlgmr.msra.gmra.mrb[0].mxu0 %v429_v39  ;;  %v430_v14 = vsub.f32 %v2468_v27, %v429_v39 }
  0xf3   : > { %1636 = vmatpush3.bf16.msra.mxu0 %v2350_v60  ;;  %1500 = vmatprep.mubr.msk.f32.mxu0 %vm2069_vm0, %v2070_v53  ;;  %v2071_v60 = vmov 1.0  }
  0xf4   : > { %1637 = vmatprep.subr.bf16.mxu0 %v2068_v1  ;;  %v431_v15 = vand.u32 4294901760, %v430_v14 }
  0xf6   : > { %1361 = vmatmul.mubr.f32.vlgmr.msra.gmra.mrb[0].mxu1 %v431_v15 }
  0xf7   : > { %1564 = vmatpush3.bf16.msra.mxu1 %v2371_v13  ;;  %1639 = vmatpush3.bf16.msra.mxu0 %v2359_v5 }
  0xf8   : > { %1565 = vmatprep.subr.bf16.mxu1 %v2068_v1  ;;  %1640 = vmatprep.subr.bf16.mxu0 %v2068_v1 }
  0xf9   : > { %1395 = vmatprep.mubr.msk.f32.mxu1 %vm2069_vm0, %v2070_v53 }
  0xfb   : > { %1567 = vmatpush3.bf16.msra.mxu1 %v2377_v30  ;;  %1642 = vmatpush3.bf16.msra.mxu0 %v2362_v8 }
  0xfc   : > { %1568 = vmatprep.subr.bf16.mxu1 %v2068_v1  ;;  %1643 = vmatprep.subr.bf16.mxu0 %v2068_v1 }
  0xff   : > { %1570 = vmatpush3.bf16.msra.mxu1 %v2382_v33  ;;  %1645 = vmatpush3.bf16.msra.mxu0 %v2379_v31 }
 0x100   : > { %1571 = vmatprep.subr.bf16.mxu1 %v2068_v1  ;;  %1646 = vmatprep.subr.bf16.mxu0 %v2068_v1 }
 0x103   : > { %1573 = vmatpush3.bf16.msra.mxu1 %v2400_v2  ;;  %1648 = vmatpush3.bf16.msra.mxu0 %v2396_v62 }
 0x104   : > { %1574 = vmatprep.subr.bf16.mxu1 %v2068_v1  ;;  %1649 = vmatprep.subr.bf16.mxu0 %v2068_v1 }
 0x107   : > { %1576 = vmatpush3.bf16.msra.mxu1 %v2414_v38  ;;  %1651 = vmatpush3.bf16.msra.mxu0 %v2416_v6 }
 0x108   : > { %1577 = vmatprep.subr.bf16.mxu1 %v2068_v1  ;;  %1652 = vmatprep.subr.bf16.mxu0 %v2068_v1 }
 0x10b   : > { %1579 = vmatpush3.bf16.msra.mxu1 %v1578_v19  ;;  %1654 = vmatpush3.bf16.msra.mxu0 %v1653_v47 }
 0x10c   : > { %1580 = vmatprep.subr.bf16.mxu1 %v2068_v1  ;;  %1655 = vmatprep.subr.bf16.mxu0 %v2068_v1 }
 0x10f   : > { %1582 = vmatpush3.bf16.msra.mxu1 %v1581_v41  ;;  %1657 = vmatpush3.bf16.msra.mxu0 %v1656_v49 }
 0x110   : > { %1583 = vmatprep.subr.bf16.mxu1 %v2068_v1  ;;  %1658 = vmatprep.subr.bf16.mxu0 %v2068_v1 }
 0x112   : > { %1501 = vmatmul.mubr.msk.f32.vlgmr.msra.gmra.mrb[0].mxu0 %vm326_vm1, %v2071_v60 }
 0x113   : > { %1585 = vmatpush3.bf16.msra.mxu1 %v1584_v61  ;;  %1660 = vmatpush3.bf16.msra.mxu0 %v2248_v16 }
 0x114   : > { %1586 = vmatprep.subr.bf16.mxu1 %v2068_v1  ;;  %1661 = vmatprep.subr.bf16.mxu0 %v2068_v1 }
 0x115   : > { %1535 = vmatprep.mubr.msk.f32.mxu0 %vm2069_vm0, %v2070_v53 }
 0x116   : > { %1396 = vmatmul.mubr.msk.f32.vlgmr.msra.gmra.mrb[0].mxu1 %vm326_vm1, %v2071_v60 }
 0x117   : > { %1588 = vmatpush3.bf16.msra.mxu1 %v1587_v63  ;;  %1663 = vmatpush3.bf16.msra.mxu0 %v2272_v28 }
 0x118   : > { %1589 = vmatprep.subr.bf16.mxu1 %v2068_v1  ;;  %1664 = vmatprep.subr.bf16.mxu0 %v2068_v1 }
 0x119   : > { %1430 = vmatprep.mubr.msk.f32.mxu1 %vm2069_vm0, %v2070_v53 }
 0x11b   : > { %1591 = vmatpush3.bf16.msra.mxu1 %v1590_v0  ;;  %1666 = vmatpush3.bf16.msra.mxu0 %v2293_v42 }
 0x11c   : > { %1592 = vmatprep.subr.bf16.mxu1 %v2068_v1  ;;  %1667 = vmatprep.subr.bf16.mxu0 %v2068_v1 }
 0x11f   : > { %1594 = vmatpush3.bf16.msra.mxu1 %v1593_v3  ;;  %1669 = vmatpush3.bf16.msra.mxu0 %v2335_v56 }
 0x120   : > { %1595 = vmatprep.subr.bf16.mxu1 %v2068_v1  ;;  %1670 = vmatprep.subr.bf16.mxu0 %v2068_v1 }
 0x123   : > { %1597 = vmatpush3.bf16.msra.mxu1 %v1596_v4  ;;  %1672 = vmatpush3.bf16.msra.mxu0 %v2369_v12 }
 0x124   : > { %1598 = vmatprep.subr.bf16.mxu1 %v2068_v1  ;;  %1673 = vmatprep.subr.bf16.mxu0 %v2068_v1 }
 0x127   : > { %1600 = vmatpush3.bf16.msra.mxu1 %v1599_v22  ;;  %1675 = vmatpush3.bf16.msra.mxu0 %v2392_v59 }
 0x128   : > { %1601 = vmatprep.subr.bf16.mxu1 %v2068_v1  ;;  %1676 = vmatprep.subr.bf16.mxu0 %v2068_v1 }
 0x12b   : > { %1603 = vmatpush3.bf16.msra.mxu1 %v1602_v26  ;;  %1678 = vmatpush3.bf16.msra.mxu0 %v2410_v34 }
 0x12c   : > { %1604 = vmatprep.subr.bf16.mxu1 %v2068_v1  ;;  %1679 = vmatprep.subr.bf16.mxu0 %v2068_v1 }
 0x12f   : > { %1606 = vmatpush3.bf16.msra.mxu1 %v1605_v7  ;;  %1681 = vmatpush3.bf16.msra.mxu0 %v2428_v35 }
 0x130   : > { %1607 = vmatprep.subr.bf16.mxu1 %v2068_v1 }
 0x132   : > { %1536 = vmatmul.mubr.msk.f32.vlgmr.msra.gmra.mrb[0].mxu0 %vm326_vm1, %v2071_v60 }
 0x133   : > { %1609 = vmatpush3.bf16.msra.mxu1 %v1608_v17 }
 0x136   : > { %1431 = vmatmul.mubr.f32.vlgmr.msra.gmra.mrb[0].mxu1 %v2468_v27 }
 0x137   : > { %1843 = shalt.err (!%p1840_p11)  }
 0x138   : > { %s1844_s1 = scalar_lea.vmem %s2591_s11, 16  ;;  %s2606_s2 = scalar_lea.vmem %s2591_s11, 128 }
 0x139   : > { %p1845_p0 = scmp.ne.s32.totalorder %s2591_s11, %s1844_s1  ;;  %p1849_p2 = scmp.lt.s32.totalorder %s2591_s11, %s2591_s11 }
 0x13a   : > { %p1850_p3 = scmp.lt.s32.totalorder %s2606_s2, %s1844_s1 }
 0x13c   : > { %p1851_p9 = por %p1850_p3, %p1849_p2 }
 0x13e   : > { %p1852_p8 = pnand %p1851_p9, %p1845_p0 }
 0x140   : > { %1855 = shalt.err (!%p1852_p8)  }
 0x141   : > { %218 = dma.hbm_to_vmem [thread:$0]  %s207_s23, 16, %s2591_s11, [#allocation3] }
 0x142   : > { %s223_s3 = sadd.s32 %s1199_s24, %s2569_s16  ;;  %s2073_s27 = smov [#allocation2 + $0x1]  }
 0x143   : > { %s1200_s22 = sshll.u32 %s223_s3, 4  ;;  %s235_s7 = sshll.u32 %s2073_s27, 4  ;;  %s236_s7 = int_to_ptr.vmem [resolvable:$true] %s235_s7 }
 0x144   : > { %s225_s14 = scalar_lea.hbm %s2729_s4, %s1200_s22 }
 0x145   : > { %s1856_s19 = scalar_lea.hbm %s225_s14, 16  ;;  %p1859_p13 = scmp.lt.u32.totalorder %s225_s14, %s2729_s4 }
 0x146   : > { %p1857_p12 = scmp.ne.s32.totalorder %s225_s14, %s1856_s19  ;;  %p1860_p1 = scmp.lt.u32.totalorder %s2597_s21, %s1856_s19 }
 0x147   : > { %p1862_p5 = scmp.lt.u32.totalorder %s1856_s19, %s225_s14 }
 0x148   : > { %p1861_p4 = por %p1860_p1, %p1859_p13 }
 0x14a   : > { %p1863_p6 = por %p1862_p5, %p1861_p4 }
 0x14c   : > { %p1864_p7 = pnand %p1863_p6, %p1857_p12 }
 0x14e   : > { %1867 = shalt.err (!%p1864_p7)  }
 0x14f   : > { %s1868_s16 = scalar_lea.vmem %s236_s7, 16  ;;  %p1873_p11 = scmp.lt.s32.totalorder %s236_s7, %s2591_s11 }
 0x150   : > { %p1869_p10 = scmp.ne.s32.totalorder %s236_s7, %s1868_s16  ;;  %p1874_p0 = scmp.lt.s32.totalorder %s2606_s2, %s1868_s16 }
 0x152   : > { %p1875_p2 = por %p1874_p0, %p1873_p11 }
 0x154   : > { %p1876_p3 = pnand %p1875_p2, %p1869_p10 }
 0x156   : > { %1879 = shalt.err (!%p1876_p3)  }
 0x157   : > { %238 = dma.hbm_to_vmem [thread:$0]  %s225_s14, 16, %s236_s7, [#allocation3 + $0x1] }
 0x158   : > { %s1201_s9 = sshll.u32 %s2571_s0, 7  ;;  %s2074_s24 = smov [#allocation2 + $0x2]  }
 0x159   : > { %s243_s23 = sadd.s32 %s1201_s9, %s2573_s25  ;;  %s255_s3 = sshll.u32 %s2074_s24, 4  ;;  %s256_s3 = int_to_ptr.vmem [resolvable:$true] %s255_s3 }
 0x15a   : > { %s1202_s22 = sshll.u32 %s243_s23, 4  ;;  %s1203_s19 = sshll.u32 %s2575_s26, 7 }
 0x15b   : > { %s245_s17 = scalar_lea.hbm %s2729_s4, %s1202_s22 }
 0x15c   : > { %s1880_s1 = scalar_lea.hbm %s245_s17, 16  ;;  %p1883_p8 = scmp.lt.u32.totalorder %s245_s17, %s2729_s4 }
 0x15d   : > { %p1881_p9 = scmp.ne.s32.totalorder %s245_s17, %s1880_s1  ;;  %p1884_p12 = scmp.lt.u32.totalorder %s2597_s21, %s1880_s1 }
 0x15e   : > { %p1886_p1 = scmp.lt.u32.totalorder %s1880_s1, %s245_s17 }
 0x15f   : > { %p1885_p13 = por %p1884_p12, %p1883_p8 }
 0x161   : > { %p1887_p4 = por %p1886_p1, %p1885_p13 }
 0x163   : > { %p1888_p5 = pnand %p1887_p4, %p1881_p9 }
 0x165   : > { %1891 = shalt.err (!%p1888_p5)  }
 0x166   : > { %s1892_s0 = scalar_lea.vmem %s256_s3, 16  ;;  %p1897_p7 = scmp.lt.s32.totalorder %s256_s3, %s2591_s11 }
 0x167   : > { %p1893_p6 = scmp.ne.s32.totalorder %s256_s3, %s1892_s0  ;;  %p1898_p10 = scmp.lt.s32.totalorder %s2606_s2, %s1892_s0 }
 0x169   : > { %p1899_p11 = por %p1898_p10, %p1897_p7 }
 0x16b   : > { %p1900_p0 = pnand %p1899_p11, %p1893_p6 }
 0x16d   : > { %1903 = shalt.err (!%p1900_p0)  }
 0x16e   : > { %258 = dma.hbm_to_vmem [thread:$0]  %s245_s17, 16, %s256_s3, [#allocation3 + $0x2] }
 0x16f   : > { %s263_s30 = sadd.s32 %s1203_s19, %s2581_s18  ;;  %s2075_s26 = smov [#allocation2 + $0x3]  }
 0x170   : > { %s1204_s25 = sshll.u32 %s263_s30, 4  ;;  %s275_s7 = sshll.u32 %s2075_s26, 4  ;;  %s276_s7 = int_to_ptr.vmem [resolvable:$true] %s275_s7 }
 0x171   : > { %s265_s23 = scalar_lea.hbm %s2729_s4, %s1204_s25 }
 0x172   : > { %s1904_s24 = scalar_lea.hbm %s265_s23, 16  ;;  %p1907_p3 = scmp.lt.u32.totalorder %s265_s23, %s2729_s4 }
 0x173   : > { %p1905_p2 = scmp.ne.s32.totalorder %s265_s23, %s1904_s24  ;;  %p1908_p9 = scmp.lt.u32.totalorder %s2597_s21, %s1904_s24 }
 0x174   : > { %p1910_p12 = scmp.lt.u32.totalorder %s1904_s24, %s265_s23 }
 0x175   : > { %p1909_p8 = por %p1908_p9, %p1907_p3 }
 0x177   : > { %p1911_p13 = por %p1910_p12, %p1909_p8 }
 0x179   : > { %p1912_p1 = pnand %p1911_p13, %p1905_p2 }
 0x17b   : > { %1915 = shalt.err (!%p1912_p1)  }
 0x17c   : > { %s1916_s18 = scalar_lea.vmem %s276_s7, 16  ;;  %p1921_p5 = scmp.lt.s32.totalorder %s276_s7, %s2591_s11 }
 0x17d   : > { %p1917_p4 = scmp.ne.s32.totalorder %s276_s7, %s1916_s18  ;;  %p1922_p6 = scmp.lt.s32.totalorder %s2606_s2, %s1916_s18 }
 0x17f   : > { %p1923_p7 = por %p1922_p6, %p1921_p5 }
 0x181   : > { %p1924_p10 = pnand %p1923_p7, %p1917_p4 }
 0x183   : > { %1927 = shalt.err (!%p1924_p10)  }
 0x184   : > { %278 = dma.hbm_to_vmem [thread:$0]  %s265_s23, 16, %s276_s7, [#allocation3 + $0x3] }
 0x185   : > { %s2759_s3 = sadd.s32 4, %s2561_s15  ;;  %s2760_s17 = sadd.s32 5, %s2561_s15 }
 0x186   : > { %s279_s10 = sld [smem:[#allocation5 + %s2759_s3]]  ;;  %s2761_s1 = smov %s2760_s17 }
 0x187   : > { %s282_s19 = sld [smem:[#allocation5 + %s2760_s17]]  ;;  %s301_s0 = sadd.s32 6, %s2561_s15 }
 0x188   : > { %s299_s16 = sld [smem:[#allocation5 + %s2761_s1]]  ;;  %s2076_s30 = smov [#allocation2 + $0x4]  }
 0x189   : > { %s295_s25 = sshll.u32 %s2076_s30, 4  ;;  %s302_s26 = sld [smem:[#allocation5 + %s301_s0]]  ;;  %s296_s25 = int_to_ptr.vmem [resolvable:$true] %s295_s25 }
 0x18a   : > { %s2077_s14 = smov [#allocation2 + $0x5]  }
 0x18b   : > { %s315_s9 = sshll.u32 %s2077_s14, 4  ;;  %s2651_s9 = int_to_ptr.vmem [resolvable:$true] %s315_s9 }
 0x18c   : > { %s1205_s24 = sshll.u32 %s279_s10, 7 }
 0x18d   : > { %s283_s7 = sadd.s32 %s1205_s24, %s282_s19 }
 0x18e   : > { %s1207_s23 = sshll.u32 %s299_s16, 7  ;;  %s1206_s22 = sshll.u32 %s283_s7, 4 }
 0x18f   : > { %s285_s3 = scalar_lea.hbm %s2729_s4, %s1206_s22  ;;  %s303_s17 = sadd.s32 %s1207_s23, %s302_s26 }
 0x190   : > { %s1928_s1 = scalar_lea.hbm %s285_s3, 16  ;;  %p1931_p0 = scmp.lt.u32.totalorder %s285_s3, %s2729_s4 }
 0x191   : > { %p1929_p11 = scmp.ne.s32.totalorder %s285_s3, %s1928_s1  ;;  %p1932_p2 = scmp.lt.u32.totalorder %s2597_s21, %s1928_s1 }
 0x192   : > { %p1934_p9 = scmp.lt.u32.totalorder %s1928_s1, %s285_s3 }
 0x193   : > { %p1933_p3 = por %p1932_p2, %p1931_p0 }
 0x195   : > { %p1935_p8 = por %p1934_p9, %p1933_p3 }
 0x197   : > { %p1936_p12 = pnand %p1935_p8, %p1929_p11 }
 0x199   : > { %1939 = shalt.err (!%p1936_p12)  }
 0x19a   : > { %s1940_s10 = scalar_lea.vmem %s296_s25, 16  ;;  %p1945_p1 = scmp.lt.s32.totalorder %s296_s25, %s2591_s11 }
 0x19b   : > { %p1941_p13 = scmp.ne.s32.totalorder %s296_s25, %s1940_s10  ;;  %p1946_p4 = scmp.lt.s32.totalorder %s2606_s2, %s1940_s10 }
 0x19d   : > { %p1947_p5 = por %p1946_p4, %p1945_p1 }
 0x19f   : > { %p1948_p6 = pnand %p1947_p5, %p1941_p13 }
 0x1a1   : > { %1951 = shalt.err (!%p1948_p6)  }
 0x1a2   : > { %298 = dma.hbm_to_vmem [thread:$0]  %s285_s3, 16, %s296_s25, [#allocation3 + $0x4] }
 0x1a3   : > { %s1208_s19 = sshll.u32 %s303_s17, 4 }
 0x1a4   : > { %s305_s16 = scalar_lea.hbm %s2729_s4, %s1208_s19 }
 0x1a5   : > { %s1952_s0 = scalar_lea.hbm %s305_s16, 16  ;;  %p1955_p10 = scmp.lt.u32.totalorder %s305_s16, %s2729_s4 }
 0x1a6   : > { %p1953_p7 = scmp.ne.s32.totalorder %s305_s16, %s1952_s0  ;;  %p1956_p11 = scmp.lt.u32.totalorder %s2597_s21, %s1952_s0 }
 0x1a7   : > { %p1958_p2 = scmp.lt.u32.totalorder %s1952_s0, %s305_s16 }
 0x1a8   : > { %p1957_p0 = por %p1956_p11, %p1955_p10 }
 0x1aa   : > { %p1959_p3 = por %p1958_p2, %p1957_p0 }
 0x1ac   : > { %p1960_p9 = pnand %p1959_p3, %p1953_p7 }
 0x1ae   : > { %1963 = shalt.err (!%p1960_p9)  }
 0x1af   : > { %s1964_s25 = scalar_lea.vmem %s2651_s9, 16  ;;  %p1969_p12 = scmp.lt.s32.totalorder %s2651_s9, %s2591_s11 }
 0x1b0   : > { %p1965_p8 = scmp.ne.s32.totalorder %s2651_s9, %s1964_s25  ;;  %p1970_p13 = scmp.lt.s32.totalorder %s2606_s2, %s1964_s25 }
 0x1b2   : > { %p1971_p1 = por %p1970_p13, %p1969_p12 }
 0x1b4   : > { %p1972_p4 = pnand %p1971_p1, %p1965_p8 }
 0x1b6   : > { %1975 = shalt.err (!%p1972_p4)  }
 0x1b7   : > { %318 = dma.hbm_to_vmem [thread:$0]  %s305_s16, 16, %s2651_s9, [#allocation3 + $0x5]  ;;  %v1213_v28 = vld [vmem:[#allocation6] ss:$0 sm:$0xff] }
 0x1b8   : > { %319 = vst [vmem:[#allocation2 + $0x6] sm:$0x3] %v2070_v53  ;;  %s195_s21 = scalar_lea.vmem [#allocation11], %s2586_s20 }
 0x205   : > { %v983_v1 = vpop.f32.mrb[0].mxu0 }
 0x206   : > { %v1537_v16 = vpop.f32.mrb[1].mxu0 }
 0x209   : > { %v688_v23 = vpop.f32.mrb[0].mxu1 }
 0x20a   : > { %v1682_v24 = vadd.f32 %v983_v1, %v688_v23  ;;  %v1432_v25 = vpop.f32.mrb[1].mxu1 }
 0x20c   : > { %v987_v29 = vmul.f32 0.5, %v1682_v24 }
 0x20e   : > { %v994_v36 = vadd.f32 %v1213_v28, %v987_v29 }
 0x20f   : > { %2030 = dma.done.wait [#allocation3], 16 }
 0x210   : > { %2031 = vsyncadd [#allocation3], 4294967280 }
 0x211   : > { %2032 = dma.done.wait [#allocation3 + $0x1], 16 }
 0x212   : > { %2033 = vsyncadd [#allocation3 + $0x1], 4294967280 }
 0x213   : > { %2034 = dma.done.wait [#allocation3 + $0x2], 16 }
 0x214   : > { %2035 = vsyncadd [#allocation3 + $0x2], 4294967280 }
 0x215   : > { %2036 = dma.done.wait [#allocation3 + $0x3], 16 }
 0x216   : > { %2037 = vsyncadd [#allocation3 + $0x3], 4294967280 }
 0x217   : > { %2038 = dma.done.wait [#allocation3 + $0x4], 16 }
 0x218   : > { %2039 = vsyncadd [#allocation3 + $0x4], 4294967280 }
 0x219   : > { %2040 = dma.done.wait [#allocation3 + $0x5], 16 }
 0x21a   : > { %2041 = vsyncadd [#allocation3 + $0x5], 4294967280  ;;  %v1008_v37 = vld [vmem:[#allocation2] sm:$0xff]  ;;  %s1026_s11 = sshll.u32 %s195_s21, 4  ;;  %s2681_s14 = scalar_lea.hbm %s2730_s5, %s2561_s15  ;;  %s2683_s11 = int_to_ptr.vmem [resolvable:$true] %s1026_s11 }
 0x21b   : > { %v1009_v42 = vmul.f32 0.2, %v1008_v37  ;;  %s2762_s9 = sand.u32 1, %s2052_s29   ;;  %s1976_s7 = scalar_lea.vmem %s2683_s11, 128 }
 0x21c   : > { %s1013_s24 = scalar_lea.sflag [#allocation8], %s2762_s9  ;;  %p1977_p5 = scmp.ne.s32.totalorder %s2683_s11, %s1976_s7 }
 0x21d   : > { %v1010_v43 = vadd.f32 %v1009_v42, %v994_v36  ;;  %p2763_p6 = scmp.ne.s32.totalorder %s2746_s12, 0  ;;  %s2078_s23 = smov [#allocation11]  }
 0x21e   : > { %s1980_s22 = sshll.u32 %s2078_s23, 4  ;;  %s1981_s22 = int_to_ptr.vmem [resolvable:$false] %s1980_s22 }
 0x21f   : > { %1011 = vst [vmem:[%s195_s21] sm:$0xff] %v1010_v43  ;;  %p1978_p7 = pnand %p1977_p5, %p2763_p6  ;;  %s1982_s27 = scalar_lea.vmem %s1981_s22, 256 }
 0x220   : > { %p1983_p11 = scmp.lt.s32.totalorder %s2683_s11, %s1981_s22  ;;  %p1984_p0 = scmp.lt.s32.totalorder %s1982_s27, %s1976_s7 }
 0x221   : > { %p1979_p10 = pneg %p1978_p7 }
 0x222   : > { %p1985_p2 = por %p1984_p0, %p1983_p11 }
 0x224   : > { %p1986_p3 = pnand %p1985_p2, %p1979_p10 }
 0x226   : > { %1989 = shalt.err (!%p1986_p3)
}
 0x227   : > { %s1990_s15 = scalar_lea.hbm %s2681_s14, 128  ;;  %s1994_s17 = scalar_lea.hbm %s2730_s5, 256 }
 0x228   : > { %p1991_p9 = scmp.ne.s32.totalorder %s2681_s14, %s1990_s15  ;;  %p1995_p13 = scmp.lt.u32.totalorder %s2681_s14, %s2730_s5 }
 0x229   : > { %p1996_p1 = scmp.lt.u32.totalorder %s1994_s17, %s1990_s15  ;;  %p1998_p5 = scmp.lt.u32.totalorder %s1990_s15, %s2681_s14 }
 0x22a   : > { %p1992_p8 = pnand %p1991_p9, %p2763_p6 }
 0x22b   : > { %p1997_p4 = por %p1996_p1, %p1995_p13 }
 0x22c   : > { %p1993_p12 = pneg %p1992_p8 }
 0x22d   : > { %p1999_p7 = por %p1998_p5, %p1997_p4 }
 0x22f   : > { %p2000_p10 = pnand %p1999_p7, %p1993_p12 }
 0x231   : > { %2003 = shalt.err (!%p2000_p10)
}
 0x232   : > { %1699 = dma.vmem_to_hbm [thread:$0]  (%p2763_p6), %s2683_s11, 128, %s2681_s14, %s1013_s24  }
 0x233 PF: > { %s2764_s19 = sld [smem:[#allocation39_spill]]  ;;  %p1716_p11 = scmp.ge.s32.totalorder %s2060_s6, 2 }
 0x234   : > { %s1038_s8 = sand.u32 1, %s2048_s28  }
 0x235   : > { %s1039_s13 = scalar_lea.sflag [#allocation8], %s1038_s8 }
 0x239   : > { %p2765_p0 = scmp.ne.s32.totalorder %s2764_s19, 0 }
 0x23b   : > { %p1709_p2 = pnand %p1716_p11, %p2765_p0 }
 0x23d   : > { %2043 = dma.done.wait (!%p1709_p2), %s1039_s13, 128  }
 0x23e   : > { %2045 = vsyncadd (!%p1709_p2), %s1039_s13, 4294967168  ;;  %s2766_s6 = sld [smem:[#allocation37_spill]]  ;;  %s2767_s16 = sld [smem:[#allocation36_spill]] }
 0x23f   : > { %s2768_s30 = sld [smem:[#allocation38_spill]]  ;;  %s2769_s28 = smov %s2052_s29 }
 0x244   : > { %p21_p3 = scmp.ge.s32.totalorder %s2766_s6, 4   ;;  %s2770_s29 = smov %s2767_s16 }
 0x246   :  { %23 = sbr.rel (!%p21_p3) target bundleno = 18 (0x12), region = 123 }
 0x24d   :  { %1044 = vsyncpa [#allocation7], 1 }
 0x24e   :  { %1046 = vsyncpa [#allocation7 + $0x1], 1 }
 0x24f   :  { %1047 = vsyncpa [#allocation10], 1 }
 0x250   :  { %1048 = vsyncpa [#allocation8], 1 }
 0x251   :  { %1050 = vsyncpa [#allocation8 + $0x1], 1 }
 0x252   :  { %1051 = vsyncmov [#allocation3] }
 0x255   :  { %s1052_s12 = vpop.sfrf %1051 }
 0x256   :  { %p1218_p6 = scmp.ne.s32.totalorder %s1052_s12, 0 }
 0x258   :  { %1056 = shalt.err (%p1218_p6)  }
 0x259   :  { %1058 = vsyncmov [#allocation3 + $0x1] }
 0x25c   :  { %s1059_s0 = vpop.sfrf %1058 }
 0x25d   :  { %p1219_p9 = scmp.ne.s32.totalorder %s1059_s0, 0 }
 0x25f   :  { %1063 = shalt.err (%p1219_p9)  }
 0x260   :  { %1065 = vsyncmov [#allocation3 + $0x2] }
 0x263   :  { %s1066_s26 = vpop.sfrf %1065 }
 0x264   :  { %p1220_p8 = scmp.ne.s32.totalorder %s1066_s26, 0 }
 0x266   :  { %1070 = shalt.err (%p1220_p8)  }
 0x267   :  { %1072 = vsyncmov [#allocation3 + $0x3] }
 0x26a   :  { %s1073_s6 = vpop.sfrf %1072 }
 0x26b   :  { %p1221_p12 = scmp.ne.s32.totalorder %s1073_s6, 0 }
 0x26d   :  { %1077 = shalt.err (%p1221_p12)  }
 0x26e   :  { %1079 = vsyncmov [#allocation3 + $0x4] }
 0x271   :  { %s1080_s4 = vpop.sfrf %1079 }
 0x272   :  { %p1222_p13 = scmp.ne.s32.totalorder %s1080_s4, 0 }
 0x274   :  { %1084 = shalt.err (%p1222_p13)  }
 0x275   :  { %1086 = vsyncmov [#allocation3 + $0x5] }
 0x278   :  { %s1087_s5 = vpop.sfrf %1086 }
 0x279   :  { %p1223_p1 = scmp.ne.s32.totalorder %s1087_s5, 0 }
 0x27b   :  { %1091 = shalt.err (%p1223_p1)  }
 0x27c   :  { %1093 = vsyncmov [#allocation3 + $0x6] }
 0x27f   :  { %s1094_s28 = vpop.sfrf %1093 }
 0x280   :  { %p1224_p4 = scmp.ne.s32.totalorder %s1094_s28, 0 }
 0x282   :  { %1098 = shalt.err (%p1224_p4)  }
 0x283   :  { %1100 = vsyncmov [#allocation3 + $0x7] }
 0x286   :  { %s1101_s29 = vpop.sfrf %1100 }
 0x287   :  { %p1225_p5 = scmp.ne.s32.totalorder %s1101_s29, 0 }
 0x289   :  { %1105 = shalt.err (%p1225_p5)  }

</bundles_post_ra>
